<compile_context>
chip_gen: v5e
topology: v5e:2x2
jax: 0.10.0
libtpu: 0.0.40
codegen_flags: <defaults>
</compile_context>

<pallas_src>
import jax
import jax.numpy as jnp
from jax.experimental import pallas as pl
from jax.experimental.pallas import tpu as pltpu


# ---------------------------------------------------------------------------
# Kernel
# ---------------------------------------------------------------------------
def _classwise_kernel(x_ref, w1_ref, b1_ref, w2_ref, b2_ref, out_ref):
    """Fused MLP + (folded) threshold head for one batch tile.

    x_ref  : [TB, D]    input features tile (bf16 or f32)
    w1_ref : [D, H]     layer-1 weight ([in, out]), VMEM-resident
    b1_ref : [1, H]     layer-1 bias (f32)
    w2_ref : [H, K+1]   layer-2 weight with folded t-head column
    b2_ref : [1, K+1]   layer-2 bias with folded t-head column (f32)
    out_ref: [TB, K+1]  combined output: cols [0,K) = g, col K = t
    """
    x = x_ref[...]
    # Layer 1: Linear + ReLU (MXU matmul, f32 accumulate; bias/ReLU on VPU in f32).
    h = jnp.dot(x, w1_ref[...], preferred_element_type=jnp.float32) + b1_ref[...]
    h = jnp.maximum(h, 0.0)
    # Layer 2 (+ folded threshold head): single narrow MXU matmul, f32 accumulate.
    h = h.astype(w2_ref.dtype)
    out = jnp.dot(h, w2_ref[...], preferred_element_type=jnp.float32) + b2_ref[...]
    out_ref[...] = out.astype(out_ref.dtype)


# ---------------------------------------------------------------------------
# Parameter preparation (done ONCE, outside the per-call path)
# ---------------------------------------------------------------------------
def _round_up(n, m):
    return ((n + m - 1) // m) * m


def prepare_kernel_params(params, dtype=jnp.bfloat16):
    """Transpose to [in, out], fold the t-head into layer 2 (in f32), then cast
    the streamed matrices to `dtype`.  Biases stay f32.

    params holds PyTorch-convention weights:
      w1: [H, D], b1: [H], w2: [K, H], b2: [K], wt: [1, K]
    """
    w1 = jnp.asarray(params["w1"], jnp.float32).T                # [D, H]
    b1 = jnp.asarray(params["b1"], jnp.float32).reshape(1, -1)   # [1, H]
    w2 = jnp.asarray(params["w2"], jnp.float32).T                # [H, K]
    b2 = jnp.asarray(params["b2"], jnp.float32).reshape(1, -1)   # [1, K]
    wt = jnp.asarray(params["wt"], jnp.float32).T                # [K, 1]

    K = int(w2.shape[1])
    # Fold threshold head IN F32 (extra column K computes t = (h@w2 + b2) @ wt).
    w2_aug = jnp.concatenate([w2, w2 @ wt], axis=1)              # [H, K+1]
    b2_aug = jnp.concatenate([b2, b2 @ wt], axis=1)              # [1, K+1]

    return {
        "w1": w1.astype(dtype),
        "b1": b1,                          # f32
        "w2_aug": w2_aug.astype(dtype),
        "b2_aug": b2_aug,                  # f32
        "K": K,
        "dtype": dtype,
    }


# ---------------------------------------------------------------------------
# Sizing helpers
# ---------------------------------------------------------------------------
def _hw_vmem_cap():
    try:
        return int(pltpu.get_tpu_info().vmem_capacity_bytes)
    except Exception:
        return 64 * 1024 * 1024   # conservative: v7x per-TC VMEM


def _vmem_plan(D, H, Ko, w_bytes):
    cap = _hw_vmem_cap()
    hard_cap = min((cap * 3) // 4, 100 << 20)   # headroom for Mosaic scratch
    # Size weights for the worst case (default double buffering) so the fallback
    # path is covered; Buffered(1) on weights only uses half of this.
    weight_bytes = 2 * ((D * H + H * Ko) * w_bytes + (H + Ko) * 4)
    # TODO(synk): if weight_bytes alone approaches hard_cap (huge DynamicMLP dims),
    #             tile the D/H contraction instead of keeping weights resident.
    tile_budget = max(hard_cap - weight_bytes - (4 << 20), 1 << 20)
    return hard_cap, weight_bytes, tile_budget


def _choose_batch_tile(B, D, H, Ko, x_bytes, tile_budget_bytes):
    """Batch tile: multiple of 8, ~4 MiB of streamed x+out per step, VMEM-bounded
    (double-buffered x/out + f32 h and pre-store temps), and keeping >=4 grid
    steps when the batch allows it (pipelining; 2 TCs on v7x)."""
    per_row_stream = D * x_bytes + Ko * 4
    tb = (4 << 20) // max(per_row_stream, 1)
    per_row_vmem = 2 * (D * x_bytes + Ko * 4) + (H + Ko) * 4
    tb = min(tb, tile_budget_bytes // max(per_row_vmem, 1))
    tb = min(tb, -(-B // 4))                 # keep >= ~4 grid steps when possible
    tb = max(8, (tb // 8) * 8)               # multiple of 8 (sublane granularity)
    tb = min(tb, _round_up(B, 8))
    return int(tb)


# ---------------------------------------------------------------------------
# Forward wrapper
# ---------------------------------------------------------------------------
def classwise_auto_labeling_forward(x, kparams):
    """Runs the fused kernel over a batch grid. Returns (g [B,K], t [B,1])."""
    dtype = kparams["dtype"]
    x = jnp.asarray(x, dtype)     # no-op if caller already provides the compute dtype
    B, D = x.shape
    w1, b1 = kparams["w1"], kparams["b1"]
    w2_aug, b2_aug = kparams["w2_aug"], kparams["b2_aug"]
    K = kparams["K"]
    H = int(w1.shape[1])
    Ko = int(w2_aug.shape[1])     # K + 1 (g columns + folded t column), no lane padding

    x_bytes = x.dtype.itemsize
    w_bytes = w1.dtype.itemsize

    hard_cap, weight_bytes, tile_budget = _vmem_plan(D, H, Ko, w_bytes)
    TB = _choose_batch_tile(B, D, H, Ko, x_bytes, tile_budget)
    grid = (pl.cdiv(B, TB),)      # ragged final block handled (masked) by Pallas

    # VMEM: double-buffered x/out tiles + f32 h & pre-store temps + weight buffers.
    vmem_needed = 2 * TB * (D * x_bytes + Ko * 4) + TB * (H + Ko) * 4 + weight_bytes
    vmem_limit = int(min(hard_cap, max(vmem_needed + (8 << 20), 16 << 20)))

    cost = pl.CostEstimate(
        flops=2 * B * (D * H + H * Ko),
        transcendentals=0,
        bytes_accessed=(B * D * x_bytes + B * Ko * 4
                        + (D * H + H * Ko) * w_bytes + (H + Ko) * 4),
    )

    def run(single_buffer_weights):
        wkw = {"pipeline_mode": pl.Buffered(1)} if single_buffer_weights else {}
        return pl.pallas_call(
            _classwise_kernel,
            out_shape=jax.ShapeDtypeStruct((B, Ko), jnp.float32),
            grid_spec=pltpu.PrefetchScalarGridSpec(
                num_scalar_prefetch=0,
                grid=grid,
                in_specs=[
                    pl.BlockSpec((TB, D), lambda i: (i, 0)),          # x: batch-tiled
                    pl.BlockSpec((D, H), lambda i: (0, 0), **wkw),    # w1: resident
                    pl.BlockSpec((1, H), lambda i: (0, 0), **wkw),    # b1
                    pl.BlockSpec((H, Ko), lambda i: (0, 0), **wkw),   # w2_aug
                    pl.BlockSpec((1, Ko), lambda i: (0, 0), **wkw),   # b2_aug
                ],
                out_specs=pl.BlockSpec((TB, Ko), lambda i: (i, 0)),
            ),
            compiler_params=pltpu.CompilerParams(
                dimension_semantics=("parallel",),   # shards batch across TCs on v7x
                vmem_limit_bytes=vmem_limit,
            ),
            cost_estimate=cost,
        )(x, w1, b1, w2_aug, b2_aug)

    try:
        out = run(True)                 # single-buffer the grid-invariant weights
        jax.block_until_ready(out)
    except Exception:
        out = run(False)                # fallback if Buffered(1) is unsupported

    g = out[:, :K]
    t = out[:, K:K + 1]
    return g, t


# ---------------------------------------------------------------------------
# Synthetic parameter init (PyTorch weight layout [out, in])
# ---------------------------------------------------------------------------
def init_params(key, input_dim, hidden_dim, num_classes):
    k1, k2, k3, k4, k5 = jax.random.split(key, 5)
    s1 = 1.0 / jnp.sqrt(input_dim)
    s2 = 1.0 / jnp.sqrt(hidden_dim)
    s3 = 1.0 / jnp.sqrt(num_classes)
    return {
        "w1": jax.random.uniform(k1, (hidden_dim, input_dim), jnp.float32, -s1, s1),
        "b1": jax.random.uniform(k2, (hidden_dim,), jnp.float32, -s1, s1),
        "w2": jax.random.uniform(k3, (num_classes, hidden_dim), jnp.float32, -s2, s2),
        "b2": jax.random.uniform(k4, (num_classes,), jnp.float32, -s2, s2),
        "wt": jax.random.uniform(k5, (1, num_classes), jnp.float32, -s3, s3),
    }


if __name__ == "__main__":
    key = jax.random.PRNGKey(0)
    kx, kp = jax.random.split(key)

    # batch (ragged vs tile on purpose), input_dim, hidden_dim, num_classes
    B, D, H, K = 70, 32, 32, 4
    x = jax.random.normal(kx, (B, D), dtype=jnp.float32)
    params = init_params(kp, D, H, K)

    kparams = prepare_kernel_params(params)              # bf16 streaming by default
    g, t = classwise_auto_labeling_forward(x, kparams)
    jax.block_until_ready((g, t))
    assert g.shape == (B, K) and t.shape == (B, 1)

    hi = jax.lax.Precision.HIGHEST

    # Reference A: identical math on the same bf16-quantized operands (tight check
    # of the kernel itself, independent of the bf16 quantization error).
    xq = x.astype(jnp.bfloat16).astype(jnp.float32)
    w1q = kparams["w1"].astype(jnp.float32)
    w2q = kparams["w2_aug"].astype(jnp.float32)
    hq = jnp.maximum(jnp.dot(xq, w1q, precision=hi) + kparams["b1"], 0.0)
    hq = hq.astype(jnp.bfloat16).astype(jnp.float32)
    outq = jnp.dot(hq, w2q, precision=hi) + kparams["b2_aug"]
    assert jnp.allclose(g, outq[:, :K], atol=1e-2, rtol=1e-2)
    assert jnp.allclose(t, outq[:, K:K + 1], atol=1e-2, rtol=1e-2)

    # Reference B: full-precision PyTorch-equivalent math (bounds bf16 streaming error).
    h_ref = jnp.maximum(jnp.dot(x, params["w1"].T, precision=hi) + params["b1"], 0.0)
    g_ref = jnp.dot(h_ref, params["w2"].T, precision=hi) + params["b2"]
    t_ref = jnp.dot(g_ref, params["wt"].T, precision=hi)
    assert jnp.allclose(g, g_ref, atol=1e-1, rtol=1e-1)
    assert jnp.allclose(t, t_ref, atol=1e-1, rtol=1e-1)

    print("KERNEL_OK")
</pallas_src>

<mosaic_0001>
module attributes {stable_mosaic.version = 11 : i64} {
  func.func @_classwise_kernel(%arg0: i32, %arg1: memref<16x32xbf16, #tpu.memory_space<vmem>>, %arg2: memref<32x32xbf16, #tpu.memory_space<vmem>>, %arg3: memref<1x32xf32, #tpu.memory_space<vmem>>, %arg4: memref<32x5xbf16, #tpu.memory_space<vmem>>, %arg5: memref<1x5xf32, #tpu.memory_space<vmem>>, %arg6: memref<16x5xf32, #tpu.memory_space<vmem>>) attributes {dimension_semantics = [#tpu.dimension_semantics<parallel>], iteration_bounds = array<i64: 5>, scalar_prefetch = 0 : i64, scratch_operands = 0 : i64, tpu.core_type = #tpu.core_type<tc>, window_params = [{transform_indices = @transform_0, window_bounds = array<i64: 16, 32>}, {pipeline_mode = #tpu.pipeline_mode<synchronous>, transform_indices = @transform_1, window_bounds = array<i64: 32, 32>}, {pipeline_mode = #tpu.pipeline_mode<synchronous>, transform_indices = @transform_2, window_bounds = array<i64: 1, 32>}, {pipeline_mode = #tpu.pipeline_mode<synchronous>, transform_indices = @transform_3, window_bounds = array<i64: 32, 5>}, {pipeline_mode = #tpu.pipeline_mode<synchronous>, transform_indices = @transform_4, window_bounds = array<i64: 1, 5>}, {transform_indices = @transform_5, window_bounds = array<i64: 16, 5>}]} {
    %c0 = arith.constant 0 : index
    %c0_0 = arith.constant 0 : index
    %0 = vector.load %arg1[%c0, %c0_0] : memref<16x32xbf16, #tpu.memory_space<vmem>>, vector<16x32xbf16>
    %c0_1 = arith.constant 0 : index
    %c0_2 = arith.constant 0 : index
    %1 = vector.load %arg2[%c0_1, %c0_2] : memref<32x32xbf16, #tpu.memory_space<vmem>>, vector<32x32xbf16>
    %cst = arith.constant dense<0.000000e+00> : vector<16x32xf32>
    %2 = tpu.matmul %0, %1, %cst {dimension_numbers = #tpu.dot_dimension_numbers<[1], [0], [0], [1], [0, 0, 1, 1], [], []>} : vector<16x32xbf16>, vector<32x32xbf16>, vector<16x32xf32> -> vector<16x32xf32>
    %c0_3 = arith.constant 0 : index
    %c0_4 = arith.constant 0 : index
    %3 = vector.load %arg3[%c0_3, %c0_4] : memref<1x32xf32, #tpu.memory_space<vmem>>, vector<1x32xf32>
    %4 = vector.broadcast %3 : vector<1x32xf32> to vector<16x32xf32>
    %5 = arith.addf %2, %4 : vector<16x32xf32>
    %cst_5 = arith.constant 0.000000e+00 : f32
    %6 = vector.broadcast %cst_5 : f32 to vector<16x32xf32>
    %7 = arith.maximumf %5, %6 : vector<16x32xf32>
    %8 = arith.truncf %7 : vector<16x32xf32> to vector<16x32xbf16>
    %c0_6 = arith.constant 0 : index
    %c0_7 = arith.constant 0 : index
    %9 = vector.load %arg4[%c0_6, %c0_7] : memref<32x5xbf16, #tpu.memory_space<vmem>>, vector<32x5xbf16>
    %cst_8 = arith.constant dense<0.000000e+00> : vector<16x5xf32>
    %10 = tpu.matmul %8, %9, %cst_8 {dimension_numbers = #tpu.dot_dimension_numbers<[1], [0], [0], [1], [0, 0, 1, 1], [], []>} : vector<16x32xbf16>, vector<32x5xbf16>, vector<16x5xf32> -> vector<16x5xf32>
    %c0_9 = arith.constant 0 : index
    %c0_10 = arith.constant 0 : index
    %11 = vector.load %arg5[%c0_9, %c0_10] : memref<1x5xf32, #tpu.memory_space<vmem>>, vector<1x5xf32>
    %12 = vector.broadcast %11 : vector<1x5xf32> to vector<16x5xf32>
    %13 = arith.addf %10, %12 : vector<16x5xf32>
    %c0_11 = arith.constant 0 : index
    %c0_12 = arith.constant 0 : index
    %14 = vector.load %arg6[%c0_11, %c0_12] : memref<16x5xf32, #tpu.memory_space<vmem>>, vector<16x5xf32>
    tpu.vector_store %arg6[%c0_11, %c0_12], %13 {strides = array<i32>} : memref<16x5xf32, #tpu.memory_space<vmem>>, vector<16x5xf32>,
    return
  }
  func.func @transform_0(%arg0: i32) -> (i32, i32) {
    %c0_i32 = arith.constant 0 : i32
    %c0_i32_0 = arith.constant 0 : i32
    return %arg0, %c0_i32 : i32, i32
  }
  func.func @transform_1(%arg0: i32) -> (i32, i32) {
    %c0_i32 = arith.constant 0 : i32
    %c0_i32_0 = arith.constant 0 : i32
    %c0_i32_1 = arith.constant 0 : i32
    return %c0_i32, %c0_i32_0 : i32, i32
  }
  func.func @transform_2(%arg0: i32) -> (i32, i32) {
    %c0_i32 = arith.constant 0 : i32
    %c0_i32_0 = arith.constant 0 : i32
    %c0_i32_1 = arith.constant 0 : i32
    return %c0_i32, %c0_i32_0 : i32, i32
  }
  func.func @transform_3(%arg0: i32) -> (i32, i32) {
    %c0_i32 = arith.constant 0 : i32
    %c0_i32_0 = arith.constant 0 : i32
    %c0_i32_1 = arith.constant 0 : i32
    return %c0_i32, %c0_i32_0 : i32, i32
  }
  func.func @transform_4(%arg0: i32) -> (i32, i32) {
    %c0_i32 = arith.constant 0 : i32
    %c0_i32_0 = arith.constant 0 : i32
    %c0_i32_1 = arith.constant 0 : i32
    return %c0_i32, %c0_i32_0 : i32, i32
  }
  func.func @transform_5(%arg0: i32) -> (i32, i32) {
    %c0_i32 = arith.constant 0 : i32
    %c0_i32_0 = arith.constant 0 : i32
    return %arg0, %c0_i32 : i32, i32
  }
}

module attributes {stable_mosaic.version = 11 : i64} {
  func.func @_classwise_kernel(%arg0: i32, %arg1: memref<16x32xbf16, #tpu.memory_space<vmem>>, %arg2: memref<32x32xbf16, #tpu.memory_space<vmem>>, %arg3: memref<1x32xf32, #tpu.memory_space<vmem>>, %arg4: memref<32x5xbf16, #tpu.memory_space<vmem>>, %arg5: memref<1x5xf32, #tpu.memory_space<vmem>>, %arg6: memref<16x5xf32, #tpu.memory_space<vmem>>) attributes {dimension_semantics = [#tpu.dimension_semantics<parallel>], iteration_bounds = array<i64: 5>, scalar_prefetch = 0 : i64, scratch_operands = 0 : i64, tpu.core_type = #tpu.core_type<tc>, window_params = [{transform_indices = @transform_0, window_bounds = array<i64: 16, 32>}, {pipeline_mode = #tpu.pipeline_mode<synchronous>, transform_indices = @transform_1, window_bounds = array<i64: 32, 32>}, {pipeline_mode = #tpu.pipeline_mode<synchronous>, transform_indices = @transform_2, window_bounds = array<i64: 1, 32>}, {pipeline_mode = #tpu.pipeline_mode<synchronous>, transform_indices = @transform_3, window_bounds = array<i64: 32, 5>}, {pipeline_mode = #tpu.pipeline_mode<synchronous>, transform_indices = @transform_4, window_bounds = array<i64: 1, 5>}, {transform_indices = @transform_5, window_bounds = array<i64: 16, 5>}]} {
    %c0 = arith.constant 0 : index
    %c0_0 = arith.constant 0 : index
    %0 = vector.load %arg1[%c0, %c0_0] : memref<16x32xbf16, #tpu.memory_space<vmem>>, vector<16x32xbf16>
    %c0_1 = arith.constant 0 : index
    %c0_2 = arith.constant 0 : index
    %1 = vector.load %arg2[%c0_1, %c0_2] : memref<32x32xbf16, #tpu.memory_space<vmem>>, vector<32x32xbf16>
    %cst = arith.constant dense<0.000000e+00> : vector<16x32xf32>
    %2 = tpu.matmul %0, %1, %cst {dimension_numbers = #tpu.dot_dimension_numbers<[1], [0], [0], [1], [0, 0, 1, 1], [], []>} : vector<16x32xbf16>, vector<32x32xbf16>, vector<16x32xf32> -> vector<16x32xf32>
    %c0_3 = arith.constant 0 : index
    %c0_4 = arith.constant 0 : index
    %3 = vector.load %arg3[%c0_3, %c0_4] : memref<1x32xf32, #tpu.memory_space<vmem>>, vector<1x32xf32>
    %4 = vector.broadcast %3 : vector<1x32xf32> to vector<16x32xf32>
    %5 = arith.addf %2, %4 : vector<16x32xf32>
    %cst_5 = arith.constant 0.000000e+00 : f32
    %6 = vector.broadcast %cst_5 : f32 to vector<16x32xf32>
    %7 = arith.maximumf %5, %6 : vector<16x32xf32>
    %8 = arith.truncf %7 : vector<16x32xf32> to vector<16x32xbf16>
    %c0_6 = arith.constant 0 : index
    %c0_7 = arith.constant 0 : index
    %9 = vector.load %arg4[%c0_6, %c0_7] : memref<32x5xbf16, #tpu.memory_space<vmem>>, vector<32x5xbf16>
    %cst_8 = arith.constant dense<0.000000e+00> : vector<16x5xf32>
    %10 = tpu.matmul %8, %9, %cst_8 {dimension_numbers = #tpu.dot_dimension_numbers<[1], [0], [0], [1], [0, 0, 1, 1], [], []>} : vector<16x32xbf16>, vector<32x5xbf16>, vector<16x5xf32> -> vector<16x5xf32>
    %c0_9 = arith.constant 0 : index
    %c0_10 = arith.constant 0 : index
    %11 = vector.load %arg5[%c0_9, %c0_10] : memref<1x5xf32, #tpu.memory_space<vmem>>, vector<1x5xf32>
    %12 = vector.broadcast %11 : vector<1x5xf32> to vector<16x5xf32>
    %13 = arith.addf %10, %12 : vector<16x5xf32>
    %c0_11 = arith.constant 0 : index
    %c0_12 = arith.constant 0 : index
    %14 = vector.load %arg6[%c0_11, %c0_12] : memref<16x5xf32, #tpu.memory_space<vmem>>, vector<16x5xf32>
    tpu.vector_store %arg6[%c0_11, %c0_12], %13 {strides = array<i32>} : memref<16x5xf32, #tpu.memory_space<vmem>>, vector<16x5xf32>,
    return
  }
  func.func @transform_0(%arg0: i32) -> (i32, i32) {
    %c0_i32 = arith.constant 0 : i32
    %c0_i32_0 = arith.constant 0 : i32
    return %arg0, %c0_i32 : i32, i32
  }
  func.func @transform_1(%arg0: i32) -> (i32, i32) {
    %c0_i32 = arith.constant 0 : i32
    %c0_i32_0 = arith.constant 0 : i32
    %c0_i32_1 = arith.constant 0 : i32
    return %c0_i32, %c0_i32_0 : i32, i32
  }
  func.func @transform_2(%arg0: i32) -> (i32, i32) {
    %c0_i32 = arith.constant 0 : i32
    %c0_i32_0 = arith.constant 0 : i32
    %c0_i32_1 = arith.constant 0 : i32
    return %c0_i32, %c0_i32_0 : i32, i32
  }
  func.func @transform_3(%arg0: i32) -> (i32, i32) {
    %c0_i32 = arith.constant 0 : i32
    %c0_i32_0 = arith.constant 0 : i32
    %c0_i32_1 = arith.constant 0 : i32
    return %c0_i32, %c0_i32_0 : i32, i32
  }
  func.func @transform_4(%arg0: i32) -> (i32, i32) {
    %c0_i32 = arith.constant 0 : i32
    %c0_i32_0 = arith.constant 0 : i32
    %c0_i32_1 = arith.constant 0 : i32
    return %c0_i32, %c0_i32_0 : i32, i32
  }
  func.func @transform_5(%arg0: i32) -> (i32, i32) {
    %c0_i32 = arith.constant 0 : i32
    %c0_i32_0 = arith.constant 0 : i32
    return %arg0, %c0_i32 : i32, i32
  }
}

</mosaic_0001>

<bundles_post_ra>
// kernel: tpu_custom_call.1
= control target key start
LH: loop header
LB: loop body
LE: loop exit
PB: predicated region body
PF: predicated region fallthrough
CT: control target
= control target key end

     0   :  { %s817_s18 = smov 0   ;;  %s819_s19 = smov 0   ;;  %s918_s0 = inlined_call_operand.vmem [shape: bf16[70,32], index: 0, kind: input, shape index: {}]   ;;  %s919_s1 = inlined_call_operand.vmem [shape: bf16[32,32], index: 1, kind: input, shape index: {}]   ;;  %s920_s2 = inlined_call_operand.vmem [shape: f32[1,32], index: 2, kind: input, shape index: {}]   ;;  %s921_s3 = inlined_call_operand.vmem [shape: bf16[32,5], index: 3, kind: input, shape index: {}]   ;;  %s922_s4 = inlined_call_operand.vmem [shape: f32[1,5], index: 4, kind: input, shape index: {}]   ;;  %s923_s5 = inlined_call_operand.vmem [shape: f32[70,5], index: 5, kind: output, shape index: {}]  }
   0x1   :  { %s821_s20 = smov 0  }
   0x2 LB: > { %s830_s21 = sadd.s32 4294967295, %s753_s20   ;;  %s832_s22 = sadd.s32 1, %s753_s20   ;;  %s753_s20 = sphi %s821_s20, %s927_s20   ;;  %s749_s19 = sphi %s819_s19, %s926_s19   ;;  %s745_s18 = sphi %s817_s18, %s925_s18  }
   0x3   : > { %s129_s23 = ssub.s32 %s753_s20, %s832_s22  ;;  %s132_s24 = sadd.s32 1, %s749_s19 }
   0x4   : > { %p130_p0 = scmp.eq.s32.totalorder %s129_s23, 0  ;;  %p142_p1 = scmp.ne.s32.totalorder %s749_s19, %s745_s18 }
   0x5   : > { %p143_p2 = scmp.eq.s32.totalorder %s830_s21, 4  ;;  %p558_p3 = scmp.ge.s32.totalorder %s753_s20, 1 }
   0x6   : > { %s840_s25 = scalar_select %p130_p0, %s749_s19, %s132_s24  }
   0x7   : > { %p842_p4 = por %p143_p2, %p142_p1  ;;  %p196_p5 = scmp.lt.s32.totalorder %s753_s20, 6 }
   0x9   : > { %p197_p6 = pnand %p558_p3, %p196_p5 }
   0xa   : > { %s850_s29 = sshll.u32 (!%p197_p6), %s830_s21, 1  ;;  %s224_s20 = sand.u32 (!%p197_p6), 1, %s745_s18  }
   0xb   : > { %200 = sbr.rel (%p197_p6) target bundleno = 340 (0x154), region = 40  ;;  %p232_p7 = scmp.lt.s32.totalorder (!%p197_p6), %s850_s29, 8 }
   0xc   : > { %s559_s23 = sshll.u32 (!%p197_p6), %s224_s20, 4 }
   0xd   : > { %s873_s28 = scalar_lea.vmem (!%p197_p6), [#allocation2], %s559_s23  }
  0x10   : > { %v603_v0 = vld [vmem:[%s919_s1 + $0x8] sm:$0xff]  ;;  %v602_v1 = vld [vmem:[%s919_s1] sm:$0xff]  ;;  %s233_s7 = scalar_select %p232_p7, %s850_s29, 8  ;;  %vm274_vm0 = vcmask 261120   ;;  %vm332_vm1 = vcmask 39936  }
  0x11   : > { %284 = vmatpush.bf16.msra.mxu0 %v603_v0  ;;  %v605_v3 = vld [vmem:[%s921_s3 + $0x8] sm:$0xff]  ;;  %v604_v4 = vld [vmem:[%s921_s3] sm:$0xff]  ;;  %s343_s18 = ssub.s32 (%p842_p4), 9, %s850_s29  ;;  %s606_s30 = sshll.u32 (%p842_p4), %s830_s21, 4 }
  0x12   : > { %s561_s8 = sshll.u32 %s233_s7, 2  ;;  %324 = vmatpush.bf16.msra.mxu1 %v605_v3  ;;  %v697_v6 = vld [vmem:[%s920_s2] ss:$0 sm:$0xff]  ;;  %p344_p8 = scmp.lt.s32.totalorder (%p842_p4), %s343_s18, 2 }
  0x13   : > { %s235_s11 = scalar_lea.vmem %s918_s0, %s561_s8  ;;  %v698_v13 = vld [vmem:[%s922_s4] ss:$0 sm:$0xff]  ;;  %s884_s8 = scalar_lea.vmem (%p842_p4), %s923_s5, %s606_s30  }
  0x14   : > { %v601_v2 = vld [vmem:[%s235_s11] sm:$0xff] }
  0x15   : > { %285 = vmatpush.bf16.msra.mxu0 %v602_v1 }
  0x16   : > { %325 = vmatpush.bf16.msra.mxu1 %v604_v4 }
  0x18   : > { %574 = vmatmul.msk.bf16.vlgmr.msra.gmra.mxu0 %vm274_vm0, %v601_v2 }
  0x95   : > { %v287_v5 = vpop.f32.mrf.mxu0 }
  0x96   : > { %v288_v7 = vadd.f32 %v697_v6, %v287_v5 }
  0x98   : > { %v292_v10 = vmax.f32 %v288_v7, 0.0 }
  0x9d   : > { %v289_v8 = vpop.f32.mrf.mxu0 }
  0x9e   : > { %v290_v9 = vadd.f32 %v697_v6, %v289_v8 }
  0xa0   : > { %v293_v11 = vmax.f32 %v290_v9, 0.0 }
  0xa2   : > { %v294_v12 = vpack.c.bf16 %v293_v11, %v292_v10 }
  0xa4   : > { %583 = vmatmul.msk.bf16.vlgmr.msra.gmra.mxu1 %vm274_vm0, %v294_v12 }
 0x121   : > { %v327_v14 = vpop.f32.mrf.mxu1 }
 0x122   : > { %v328_v15 = vadd.f32 %v698_v13, %v327_v14 }
 0x124   : > { %333 = vst.msk [vmem:[%s873_s28] sm:$0xff] %vm332_vm1, %v328_v15 }
 0x128   : > { %341 = sbr.rel (!%p842_p4) target bundleno = 340 (0x154), region = 44 }
 0x129   : > { %v329_v16 = vpop.f32.mrf.mxu1 }
 0x12a   : > { %v330_v17 = vadd.f32 %v698_v13, %v329_v16 }
 0x12c   : > { %334 = vst.msk [vmem:[%s873_s28 + $0x8] sm:$0xff] %vm332_vm1, %v330_v17 }
 0x12d   : > { %s929_s18 = smov (!%p344_p8, %s343_s18), 2 }
 0x12e   : > { %s586_s9 = sshll.u32 %s929_s18, 3 }
 0x12f   : > { %p589_p9 = scmp.eq.s32.totalorder %s586_s9, 0 }
 0x130   : > { %s890_s10 = sshrl.u32 (!%p589_p9), %s929_s18, 1 }
 0x131   : > { %352 = sbr.rel (%p589_p9) target bundleno = 340 (0x154), region = 48  ;;  %p590_p10 = scmp.le.s32.totalorder (!%p589_p9), %s890_s10, 0 }
 0x136   : > { %511 = sbr.rel (%p590_p10) target bundleno = 323 (0x143), region = 124  ;;  %s755_s21 = smov (!%p590_p10), %s884_s8  }
 0x137   : > { %s759_s26 = smov (!%p590_p10), %s873_s28   ;;  %s763_s29 = smov (!%p590_p10), 0  }
 0x138   : > { %s767_s11 = smov (!%p590_p10), 0  }
 0x13b LB: >> { %v417_v18 = vld [vmem:[%s761_s26] sm:$0xff]  ;;  %v419_v19 = vld [vmem:[%s761_s26 + $0x8] sm:$0xff]  ;;  %s421_s12 = sadd.s32 1, %s765_s29  ;;  %s411_s11 = sadd.s32 1, %s769_s11   ;;  %s769_s11 = sphi %s767_s11, %s411_s11   ;;  %s765_s29 = sphi %s763_s29, %s764_s29   ;;  %s761_s26 = sphi %s759_s26, %s426_s26   ;;  %s757_s21 = sphi %s755_s21, %s427_s21  }
 0x13c   : >> { %418 = vst [vmem:[%s757_s21] sm:$0xff] %v417_v18  ;;  %p422_p11 = scmp.ge.s32.totalorder %s421_s12, %s890_s10  ;;  %p410_p12 = scmp.ge.s32.totalorder %s411_s11, %s890_s10 }
 0x13d   : >> { %420 = vst [vmem:[%s757_s21 + $0x8] sm:$0xff] %v419_v19 }
 0x13e   : >> { %s931_s12 = smov (%p422_p11, %s421_s12), 0  ;;  %413 = sbr.rel (!%p410_p12) target bundleno = 315 (0x13b), region = 130 }
 0x13f   : >> { %s591_s13 = sshll.u32 %s931_s12, 4  ;;  %s764_s29 = smov %s931_s12  }
 0x140   : >> { %s426_s26 = scalar_lea.vmem %s873_s28, %s591_s13 [#allocation2]   ;;  %s427_s21 = scalar_lea.vmem %s884_s8, %s591_s13  }
 0x143 PF: > { %s900_s14 = sand.u32 1, %s929_s18   ;;  %s607_s15 = sshll.u32 %s890_s10, 4 }
 0x144   : > { %s432_s16 = scalar_lea.vmem %s873_s28, %s607_s15 [#allocation2]   ;;  %s434_s17 = scalar_lea.vmem %s884_s8, %s607_s15  }
 0x145   : > { %p596_p13 = scmp.le.s32.totalorder %s900_s14, 0 }
 0x146   : > { %s771_s20 = smov (!%p596_p13), %s434_s17   ;;  %s775_s23 = smov (!%p596_p13), %s432_s16  }
 0x147   : > { %525 = sbr.rel (%p596_p13) target bundleno = 340 (0x154), region = 135  ;;  %s779_s24 = smov (!%p596_p13), 0  }
 0x148   : > { %s783_s27 = smov (!%p596_p13), 0  }
 0x14c LB: >> { %v444_v20 = vld [vmem:[%s777_s23] sm:$0xff]  ;;  %s446_s18 = sadd.s32 1, %s781_s24  ;;  %s438_s27 = sadd.s32 1, %s785_s27   ;;  %s785_s27 = sphi %s783_s27, %s438_s27   ;;  %s781_s24 = sphi %s779_s24, %s780_s24   ;;  %s777_s23 = sphi %s775_s23, %s451_s23   ;;  %s773_s20 = sphi %s771_s20, %s452_s20  }
 0x14d   : >> { %445 = vst [vmem:[%s773_s20] sm:$0xff] %v444_v20  ;;  %p447_p0 = scmp.ge.s32.totalorder %s446_s18, %s900_s14  ;;  %p437_p1 = scmp.ge.s32.totalorder %s438_s27, %s900_s14 }
 0x14f   : >> { %s933_s18 = smov (%p447_p0, %s446_s18), 0  ;;  %440 = sbr.rel (!%p437_p1) target bundleno = 332 (0x14c), region = 141 }
 0x150   : >> { %s597_s28 = sshll.u32 %s933_s18, 3  ;;  %s780_s24 = smov %s933_s18  }
 0x151   : >> { %s451_s23 = scalar_lea.vmem %s432_s16, %s597_s28 [#allocation2]   ;;  %s452_s20 = scalar_lea.vmem %s434_s17, %s597_s28  }
 0x154 PF: > { %p12_p2 = scmp.ge.s32.totalorder %s832_s22, 7   ;;  %s925_s18 = smov %s749_s19 }
 0x155   : > { %s926_s19 = smov %s840_s25  ;;  %s927_s20 = smov %s832_s22 }
 0x156   :  { %14 = sbr.rel (!%p12_p2) target bundleno = 2 (0x2), region = 152 }

// kernel: tpu_custom_call.1
= control target key start
LH: loop header
LB: loop body
LE: loop exit
PB: predicated region body
PF: predicated region fallthrough
CT: control target
= control target key end

     0   :  { %s817_s18 = smov 0   ;;  %s819_s19 = smov 0   ;;  %s918_s0 = inlined_call_operand.vmem [shape: bf16[70,32], index: 0, kind: input, shape index: {}]   ;;  %s919_s1 = inlined_call_operand.vmem [shape: bf16[32,32], index: 1, kind: input, shape index: {}]   ;;  %s920_s2 = inlined_call_operand.vmem [shape: f32[1,32], index: 2, kind: input, shape index: {}]   ;;  %s921_s3 = inlined_call_operand.vmem [shape: bf16[32,5], index: 3, kind: input, shape index: {}]   ;;  %s922_s4 = inlined_call_operand.vmem [shape: f32[1,5], index: 4, kind: input, shape index: {}]   ;;  %s923_s5 = inlined_call_operand.vmem [shape: f32[70,5], index: 5, kind: output, shape index: {}]  }
   0x1   :  { %s821_s20 = smov 0  }
   0x2 LB: > { %s830_s21 = sadd.s32 4294967295, %s753_s20   ;;  %s832_s22 = sadd.s32 1, %s753_s20   ;;  %s753_s20 = sphi %s821_s20, %s927_s20   ;;  %s749_s19 = sphi %s819_s19, %s926_s19   ;;  %s745_s18 = sphi %s817_s18, %s925_s18  }
   0x3   : > { %s129_s23 = ssub.s32 %s753_s20, %s832_s22  ;;  %s132_s24 = sadd.s32 1, %s749_s19 }
   0x4   : > { %p130_p0 = scmp.eq.s32.totalorder %s129_s23, 0  ;;  %p142_p1 = scmp.ne.s32.totalorder %s749_s19, %s745_s18 }
   0x5   : > { %p143_p2 = scmp.eq.s32.totalorder %s830_s21, 4  ;;  %p558_p3 = scmp.ge.s32.totalorder %s753_s20, 1 }
   0x6   : > { %s840_s25 = scalar_select %p130_p0, %s749_s19, %s132_s24  }
   0x7   : > { %p842_p4 = por %p143_p2, %p142_p1  ;;  %p196_p5 = scmp.lt.s32.totalorder %s753_s20, 6 }
   0x9   : > { %p197_p6 = pnand %p558_p3, %p196_p5 }
   0xa   : > { %s850_s29 = sshll.u32 (!%p197_p6), %s830_s21, 1  ;;  %s224_s20 = sand.u32 (!%p197_p6), 1, %s745_s18  }
   0xb   : > { %200 = sbr.rel (%p197_p6) target bundleno = 340 (0x154), region = 40  ;;  %p232_p7 = scmp.lt.s32.totalorder (!%p197_p6), %s850_s29, 8 }
   0xc   : > { %s559_s23 = sshll.u32 (!%p197_p6), %s224_s20, 4 }
   0xd   : > { %s873_s28 = scalar_lea.vmem (!%p197_p6), [#allocation2], %s559_s23  }
  0x10   : > { %v603_v0 = vld [vmem:[%s919_s1 + $0x8] sm:$0xff]  ;;  %v602_v1 = vld [vmem:[%s919_s1] sm:$0xff]  ;;  %s233_s7 = scalar_select %p232_p7, %s850_s29, 8  ;;  %vm274_vm0 = vcmask 261120   ;;  %vm332_vm1 = vcmask 39936  }
  0x11   : > { %284 = vmatpush.bf16.msra.mxu0 %v603_v0  ;;  %v605_v3 = vld [vmem:[%s921_s3 + $0x8] sm:$0xff]  ;;  %v604_v4 = vld [vmem:[%s921_s3] sm:$0xff]  ;;  %s343_s18 = ssub.s32 (%p842_p4), 9, %s850_s29  ;;  %s606_s30 = sshll.u32 (%p842_p4), %s830_s21, 4 }
  0x12   : > { %s561_s8 = sshll.u32 %s233_s7, 2  ;;  %324 = vmatpush.bf16.msra.mxu1 %v605_v3  ;;  %v697_v6 = vld [vmem:[%s920_s2] ss:$0 sm:$0xff]  ;;  %p344_p8 = scmp.lt.s32.totalorder (%p842_p4), %s343_s18, 2 }
  0x13   : > { %s235_s11 = scalar_lea.vmem %s918_s0, %s561_s8  ;;  %v698_v13 = vld [vmem:[%s922_s4] ss:$0 sm:$0xff]  ;;  %s884_s8 = scalar_lea.vmem (%p842_p4), %s923_s5, %s606_s30  }
  0x14   : > { %v601_v2 = vld [vmem:[%s235_s11] sm:$0xff] }
  0x15   : > { %285 = vmatpush.bf16.msra.mxu0 %v602_v1 }
  0x16   : > { %325 = vmatpush.bf16.msra.mxu1 %v604_v4 }
  0x18   : > { %574 = vmatmul.msk.bf16.vlgmr.msra.gmra.mxu0 %vm274_vm0, %v601_v2 }
  0x95   : > { %v287_v5 = vpop.f32.mrf.mxu0 }
  0x96   : > { %v288_v7 = vadd.f32 %v697_v6, %v287_v5 }
  0x98   : > { %v292_v10 = vmax.f32 %v288_v7, 0.0 }
  0x9d   : > { %v289_v8 = vpop.f32.mrf.mxu0 }
  0x9e   : > { %v290_v9 = vadd.f32 %v697_v6, %v289_v8 }
  0xa0   : > { %v293_v11 = vmax.f32 %v290_v9, 0.0 }
  0xa2   : > { %v294_v12 = vpack.c.bf16 %v293_v11, %v292_v10 }
  0xa4   : > { %583 = vmatmul.msk.bf16.vlgmr.msra.gmra.mxu1 %vm274_vm0, %v294_v12 }
 0x121   : > { %v327_v14 = vpop.f32.mrf.mxu1 }
 0x122   : > { %v328_v15 = vadd.f32 %v698_v13, %v327_v14 }
 0x124   : > { %333 = vst.msk [vmem:[%s873_s28] sm:$0xff] %vm332_vm1, %v328_v15 }
 0x128   : > { %341 = sbr.rel (!%p842_p4) target bundleno = 340 (0x154), region = 44 }
 0x129   : > { %v329_v16 = vpop.f32.mrf.mxu1 }
 0x12a   : > { %v330_v17 = vadd.f32 %v698_v13, %v329_v16 }
 0x12c   : > { %334 = vst.msk [vmem:[%s873_s28 + $0x8] sm:$0xff] %vm332_vm1, %v330_v17 }
 0x12d   : > { %s929_s18 = smov (!%p344_p8, %s343_s18), 2 }
 0x12e   : > { %s586_s9 = sshll.u32 %s929_s18, 3 }
 0x12f   : > { %p589_p9 = scmp.eq.s32.totalorder %s586_s9, 0 }
 0x130   : > { %s890_s10 = sshrl.u32 (!%p589_p9), %s929_s18, 1 }
 0x131   : > { %352 = sbr.rel (%p589_p9) target bundleno = 340 (0x154), region = 48  ;;  %p590_p10 = scmp.le.s32.totalorder (!%p589_p9), %s890_s10, 0 }
 0x136   : > { %511 = sbr.rel (%p590_p10) target bundleno = 323 (0x143), region = 124  ;;  %s755_s21 = smov (!%p590_p10), %s884_s8  }
 0x137   : > { %s759_s26 = smov (!%p590_p10), %s873_s28   ;;  %s763_s29 = smov (!%p590_p10), 0  }
 0x138   : > { %s767_s11 = smov (!%p590_p10), 0  }
 0x13b LB: >> { %v417_v18 = vld [vmem:[%s761_s26] sm:$0xff]  ;;  %v419_v19 = vld [vmem:[%s761_s26 + $0x8] sm:$0xff]  ;;  %s421_s12 = sadd.s32 1, %s765_s29  ;;  %s411_s11 = sadd.s32 1, %s769_s11   ;;  %s769_s11 = sphi %s767_s11, %s411_s11   ;;  %s765_s29 = sphi %s763_s29, %s764_s29   ;;  %s761_s26 = sphi %s759_s26, %s426_s26   ;;  %s757_s21 = sphi %s755_s21, %s427_s21  }
 0x13c   : >> { %418 = vst [vmem:[%s757_s21] sm:$0xff] %v417_v18  ;;  %p422_p11 = scmp.ge.s32.totalorder %s421_s12, %s890_s10  ;;  %p410_p12 = scmp.ge.s32.totalorder %s411_s11, %s890_s10 }
 0x13d   : >> { %420 = vst [vmem:[%s757_s21 + $0x8] sm:$0xff] %v419_v19 }
 0x13e   : >> { %s931_s12 = smov (%p422_p11, %s421_s12), 0  ;;  %413 = sbr.rel (!%p410_p12) target bundleno = 315 (0x13b), region = 130 }
 0x13f   : >> { %s591_s13 = sshll.u32 %s931_s12, 4  ;;  %s764_s29 = smov %s931_s12  }
 0x140   : >> { %s426_s26 = scalar_lea.vmem %s873_s28, %s591_s13 [#allocation2]   ;;  %s427_s21 = scalar_lea.vmem %s884_s8, %s591_s13  }
 0x143 PF: > { %s900_s14 = sand.u32 1, %s929_s18   ;;  %s607_s15 = sshll.u32 %s890_s10, 4 }
 0x144   : > { %s432_s16 = scalar_lea.vmem %s873_s28, %s607_s15 [#allocation2]   ;;  %s434_s17 = scalar_lea.vmem %s884_s8, %s607_s15  }
 0x145   : > { %p596_p13 = scmp.le.s32.totalorder %s900_s14, 0 }
 0x146   : > { %s771_s20 = smov (!%p596_p13), %s434_s17   ;;  %s775_s23 = smov (!%p596_p13), %s432_s16  }
 0x147   : > { %525 = sbr.rel (%p596_p13) target bundleno = 340 (0x154), region = 135  ;;  %s779_s24 = smov (!%p596_p13), 0  }
 0x148   : > { %s783_s27 = smov (!%p596_p13), 0  }
 0x14c LB: >> { %v444_v20 = vld [vmem:[%s777_s23] sm:$0xff]  ;;  %s446_s18 = sadd.s32 1, %s781_s24  ;;  %s438_s27 = sadd.s32 1, %s785_s27   ;;  %s785_s27 = sphi %s783_s27, %s438_s27   ;;  %s781_s24 = sphi %s779_s24, %s780_s24   ;;  %s777_s23 = sphi %s775_s23, %s451_s23   ;;  %s773_s20 = sphi %s771_s20, %s452_s20  }
 0x14d   : >> { %445 = vst [vmem:[%s773_s20] sm:$0xff] %v444_v20  ;;  %p447_p0 = scmp.ge.s32.totalorder %s446_s18, %s900_s14  ;;  %p437_p1 = scmp.ge.s32.totalorder %s438_s27, %s900_s14 }
 0x14f   : >> { %s933_s18 = smov (%p447_p0, %s446_s18), 0  ;;  %440 = sbr.rel (!%p437_p1) target bundleno = 332 (0x14c), region = 141 }
 0x150   : >> { %s597_s28 = sshll.u32 %s933_s18, 3  ;;  %s780_s24 = smov %s933_s18  }
 0x151   : >> { %s451_s23 = scalar_lea.vmem %s432_s16, %s597_s28 [#allocation2]   ;;  %s452_s20 = scalar_lea.vmem %s434_s17, %s597_s28  }
 0x154 PF: > { %p12_p2 = scmp.ge.s32.totalorder %s832_s22, 7   ;;  %s925_s18 = smov %s749_s19 }
 0x155   : > { %s926_s19 = smov %s840_s25  ;;  %s927_s20 = smov %s832_s22 }
 0x156   :  { %14 = sbr.rel (!%p12_p2) target bundleno = 2 (0x2), region = 152 }

</bundles_post_ra>
